<compile_context>
chip_gen: v6e
topology: v6e:2x2x1
jax: 0.10.0
libtpu: 0.0.40
codegen_flags: <defaults>
</compile_context>

<pallas_src>
import jax
import jax.numpy as jnp
from jax.experimental import pallas as pl
from jax.experimental.pallas import tpu as pltpu


def _patch_merge_kernel(x_ref, w_ref, cb_ref, o_ref):
    # x_ref : (tr, 2, Wh, 2C)  parity 0 = even input row -> lanes [x0 | x2]
    #                          parity 1 = odd  input row -> lanes [x1 | x3]
    # w_ref : (2, 2C, Cop) bf16  gamma-scaled, parity-split projection weight
    # cb_ref: (2, Cop)  f32      row 0 = colsum(gamma*W), row 1 = beta @ W
    # o_ref : (tr, Wh, Cop)
    x = x_ref[...].astype(jnp.float32)            # (tr, 2, Wh, 2C)
    xe = x[:, 0]                                  # (tr, Wh, 2C)
    xo = x[:, 1]
    tr, wh, c2 = xe.shape
    inv_n = 1.0 / (2.0 * c2)                      # 1 / (4C)

    # One-pass LayerNorm statistics over the 4C features of each merged token.
    s1 = jnp.sum(xe, axis=-1, keepdims=True) + jnp.sum(xo, axis=-1, keepdims=True)
    s2 = (jnp.sum(xe * xe, axis=-1, keepdims=True)
          + jnp.sum(xo * xo, axis=-1, keepdims=True))
    mean = s1 * inv_n
    var = jnp.maximum(s2 * inv_n - mean * mean, 0.0)   # guard f32 cancellation
    rstd = jax.lax.rsqrt(var + 1e-5)              # nn.LayerNorm default eps
    ms = mean * rstd                              # (tr, Wh, 1)

    # LN affine + mean subtraction are folded into the projection weights:
    #   y = (x*rstd) @ (gamma*W) - (mean*rstd)*colsum + beta @ W
    # TODO(synk): for Wh % 8 != 0 stages (e.g. 14x14 -> Wh = 7) these reshapes
    # incur an in-VMEM relayout; a padded-Wh / 3-D-contraction variant would
    # avoid it (not needed for the power-of-two resolutions exercised here).
    a = (xe * rstd).reshape(tr * wh, c2).astype(jnp.bfloat16)
    b = (xo * rstd).reshape(tr * wh, c2).astype(jnp.bfloat16)
    w = w_ref[...]
    y = jnp.dot(a, w[0], preferred_element_type=jnp.float32)
    y = y + jnp.dot(b, w[1], preferred_element_type=jnp.float32)
    y = y.reshape(tr, wh, -1)

    cb = cb_ref[...]
    y = y - ms * cb[0:1, :] + cb[1:2, :]
    o_ref[...] = y.astype(o_ref.dtype)


def _vmem_plan():
    """Generation-aware per-step input budget / VMEM limit / TC count."""
    conservative = dict(in_bytes=4 << 20, vmem_limit=32 << 20, num_tc=2)
    try:
        cap = int(pltpu.get_tpu_info().vmem_capacity_bytes)
    except Exception:
        return conservative                      # unknown chip: safe everywhere
    if cap <= (96 << 20):                        # v7x-class: 64 MiB/TC, 2 TCs
        return conservative
    # v5e / v6e: 128 MiB VMEM, slower HBM per tile byte -> bigger blocks.
    return dict(in_bytes=12 << 20, vmem_limit=96 << 20, num_tc=1)


def _pick_row_tile(R, rows_cap, min_steps, steps_mult):
    """Largest divisor of R that fits the VMEM row budget, preferring a grid
    with >= min_steps steps whose count is a multiple of steps_mult (so every
    TensorCore gets >= 2 pipelined steps on megacore parts).  Never returns a
    single whole-array block unless R itself is tiny."""
    rows_cap = max(1, min(rows_cap, R))
    divs = [d for d in range(1, rows_cap + 1) if R % d == 0]
    for pred in (
        lambda d: R // d >= min_steps and (R // d) % steps_mult == 0,
        lambda d: R // d >= min_steps,
        lambda d: True,
    ):
        cand = [d for d in divs if pred(d)]
        if cand:
            return max(cand)
    return 1


def patch_merging(x, gamma, beta, weight_t, input_resolution):
    """x: (B, H*W, C); gamma/beta: (4C,); weight_t: (4C, 2C) (= torch W.T).

    Returns (B, (H/2)*(W/2), 2C) in x.dtype."""
    H, W = input_resolution
    B, L, C = x.shape
    assert L == H * W, "input feature has wrong size"
    assert H % 2 == 0 and W % 2 == 0, "x size not even"

    R = B * (H // 2)
    Wh = W // 2
    C2 = 2 * C                      # lanes per parity half
    Co = 2 * C                      # true output channels
    Cop = 128 if Co < 128 else Co   # lane-dense (unmasked) output stores

    # Free contiguous reshape: (B, H, W, C) -> (R, 2, Wh, 2C) where
    #   xr[r, 0, j, :] = [x(b,2i,2j)   | x(b,2i,2j+1)  ] = [x0 | x2]
    #   xr[r, 1, j, :] = [x(b,2i+1,2j) | x(b,2i+1,2j+1)] = [x1 | x3]
    xr = x.reshape(R, 2, Wh, C2)

    # Fold LayerNorm affine + mean subtraction into the projection (tiny,
    # one-off parameter math done in XLA):
    #   y = ((x-mean)*rstd*gamma + beta) @ W
    #     = (x*rstd) @ (gamma*W) - (mean*rstd)*colsum(gamma*W) + beta @ W
    g = gamma.astype(jnp.float32)
    bt = beta.astype(jnp.float32)
    wt = weight_t.astype(jnp.float32)
    gw = g[:, None] * wt                                       # (4C, Co)
    colsum = jnp.sum(gw, axis=0)                               # (Co,)
    bias = bt @ wt                                             # (Co,)
    # Parity-permuted halves (torch concat order [x0,x1,x2,x3] -> even [x0|x2],
    # odd [x1|x3]) so the kernel never lane-concatenates the 4C layout.
    we = jnp.concatenate([gw[:C], gw[2 * C:3 * C]], axis=0)    # (2C, Co)
    wo = jnp.concatenate([gw[C:2 * C], gw[3 * C:]], axis=0)    # (2C, Co)
    w_all = jnp.stack([we, wo], axis=0).astype(jnp.bfloat16)   # (2, 2C, Co)
    cb = jnp.stack([colsum, bias], axis=0)                     # (2, Co) f32
    if Cop != Co:                          # zero-pad output lanes to 128
        w_all = jnp.pad(w_all, ((0, 0), (0, 0), (0, Cop - Co)))
        cb = jnp.pad(cb, ((0, 0), (0, Cop - Co)))

    plan = _vmem_plan()
    bytes_per_row_in = 2 * Wh * C2 * x.dtype.itemsize          # one (2,Wh,2C) slab
    rows_cap = max(1, plan["in_bytes"] // max(1, bytes_per_row_in))
    tr = _pick_row_tile(R, rows_cap,
                        min_steps=2 * plan["num_tc"],
                        steps_mult=plan["num_tc"])
    grid = (R // tr,)

    out = pl.pallas_call(
        _patch_merge_kernel,
        out_shape=jax.ShapeDtypeStruct((R, Wh, Cop), x.dtype),
        grid_spec=pltpu.PrefetchScalarGridSpec(
            num_scalar_prefetch=0,
            grid=grid,
            in_specs=[
                pl.BlockSpec((tr, 2, Wh, C2), lambda i: (i, 0, 0, 0)),
                pl.BlockSpec((2, C2, Cop), lambda i: (0, 0, 0)),
                pl.BlockSpec((2, Cop), lambda i: (0, 0)),
            ],
            out_specs=pl.BlockSpec((tr, Wh, Cop), lambda i: (i, 0, 0)),
        ),
        compiler_params=pltpu.CompilerParams(
            dimension_semantics=("parallel",),     # shards rows over v7x's 2 TCs
            vmem_limit_bytes=plan["vmem_limit"],
        ),
    )(xr, w_all, cb)

    if Cop != Co:
        out = out[..., :Co]
    return out.reshape(B, (H // 2) * Wh, Co)


def patch_merging_ref(x, gamma, beta, weight_t, input_resolution):
    """Pure-JAX f32 reference (mirrors the PyTorch module)."""
    H, W = input_resolution
    B, L, C = x.shape
    xr = x.reshape(B, H, W, C)
    x0 = xr[:, 0::2, 0::2, :]
    x1 = xr[:, 1::2, 0::2, :]
    x2 = xr[:, 0::2, 1::2, :]
    x3 = xr[:, 1::2, 1::2, :]
    xm = jnp.concatenate([x0, x1, x2, x3], -1).reshape(B, -1, 4 * C)
    mean = jnp.mean(xm, -1, keepdims=True)
    var = jnp.mean((xm - mean) ** 2, -1, keepdims=True)
    xn = (xm - mean) / jnp.sqrt(var + 1e-5) * gamma + beta
    return xn @ weight_t


if __name__ == "__main__":
    # Small shapes consistent with the module: B=2, H=W=16, dim(C)=32.
    B, H, W, C = 2, 16, 16, 32
    key = jax.random.PRNGKey(0)
    kx, kw, kg, kb = jax.random.split(key, 4)

    x = jax.random.normal(kx, (B, H * W, C), dtype=jnp.float32)

    # Non-trivial LayerNorm affine so the parity permutation / fold is exercised.
    gamma = 1.0 + 0.1 * jax.random.normal(kg, (4 * C,), dtype=jnp.float32)
    beta = 0.05 * jax.random.normal(kb, (4 * C,), dtype=jnp.float32)
    # Linear(4C -> 2C, bias=False): torch weight is (2C, 4C); ship its
    # transpose (4C, 2C) so the kernel computes x @ W^T directly.
    w_torch = jax.random.normal(kw, (2 * C, 4 * C), dtype=jnp.float32) * 0.02
    weight_t = w_torch.T

    run = jax.jit(patch_merging, static_argnums=(4,))
    out = jax.block_until_ready(run(x, gamma, beta, weight_t, (H, W)))

    ref = patch_merging_ref(x, gamma, beta, weight_t, (H, W))
    assert out.shape == (B, (H // 2) * (W // 2), 2 * C)
    # bf16 MXU path (f32 accumulation) vs. pure-f32 reference -> loose tol.
    err = float(jnp.max(jnp.abs(out - ref)))
    assert jnp.allclose(out, ref, atol=2e-2, rtol=2e-2), f"max abs err {err}"

    print("KERNEL_OK")
</pallas_src>

<mosaic_0001>
module attributes {stable_mosaic.version = 11 : i64} {
  func.func @_patch_merge_kernel(%arg0: i32, %arg1: memref<4x2x8x64xf32, #tpu.memory_space<vmem>>, %arg2: memref<2x64x128xbf16, #tpu.memory_space<vmem>>, %arg3: memref<2x128xf32, #tpu.memory_space<vmem>>, %arg4: memref<4x8x128xf32, #tpu.memory_space<vmem>>) attributes {dimension_semantics = [#tpu.dimension_semantics<parallel>], iteration_bounds = array<i64: 4>, scalar_prefetch = 0 : i64, scratch_operands = 0 : i64, tpu.core_type = #tpu.core_type<tc>, window_params = [{transform_indices = @transform_0, window_bounds = array<i64: 4, 2, 8, 64>}, {pipeline_mode = #tpu.pipeline_mode<synchronous>, transform_indices = @transform_1, window_bounds = array<i64: 2, 64, 128>}, {pipeline_mode = #tpu.pipeline_mode<synchronous>, transform_indices = @transform_2, window_bounds = array<i64: 2, 128>}, {transform_indices = @transform_3, window_bounds = array<i64: 4, 8, 128>}]} {
    %c0 = arith.constant 0 : index
    %c0_0 = arith.constant 0 : index
    %c0_1 = arith.constant 0 : index
    %c0_2 = arith.constant 0 : index
    %0 = vector.load %arg1[%c0, %c0_0, %c0_1, %c0_2] : memref<4x2x8x64xf32, #tpu.memory_space<vmem>>, vector<4x2x8x64xf32>
    %1 = vector.extract_strided_slice %0 {offsets = [0, 0, 0, 0], sizes = [4, 1, 8, 64], strides = [1, 1, 1, 1]} : vector<4x2x8x64xf32> to vector<4x1x8x64xf32>
    %2 = vector.shape_cast %1 : vector<4x1x8x64xf32> to vector<4x8x64xf32>
    %3 = vector.extract_strided_slice %0 {offsets = [0, 1, 0, 0], sizes = [4, 1, 8, 64], strides = [1, 1, 1, 1]} : vector<4x2x8x64xf32> to vector<4x1x8x64xf32>
    %4 = vector.shape_cast %3 : vector<4x1x8x64xf32> to vector<4x8x64xf32>
    %cst = arith.constant dense<0.000000e+00> : vector<4x8xf32>
    %5 = vector.multi_reduction <add>, %2, %cst [2] : vector<4x8x64xf32> to vector<4x8xf32>
    %6 = vector.shape_cast %5 : vector<4x8xf32> to vector<4x8x1xf32>
    %cst_3 = arith.constant dense<0.000000e+00> : vector<4x8xf32>
    %7 = vector.multi_reduction <add>, %4, %cst_3 [2] : vector<4x8x64xf32> to vector<4x8xf32>
    %8 = vector.shape_cast %7 : vector<4x8xf32> to vector<4x8x1xf32>
    %9 = arith.addf %6, %8 : vector<4x8x1xf32>
    %10 = arith.mulf %2, %2 : vector<4x8x64xf32>
    %cst_4 = arith.constant dense<0.000000e+00> : vector<4x8xf32>
    %11 = vector.multi_reduction <add>, %10, %cst_4 [2] : vector<4x8x64xf32> to vector<4x8xf32>
    %12 = vector.shape_cast %11 : vector<4x8xf32> to vector<4x8x1xf32>
    %13 = arith.mulf %4, %4 : vector<4x8x64xf32>
    %cst_5 = arith.constant dense<0.000000e+00> : vector<4x8xf32>
    %14 = vector.multi_reduction <add>, %13, %cst_5 [2] : vector<4x8x64xf32> to vector<4x8xf32>
    %15 = vector.shape_cast %14 : vector<4x8xf32> to vector<4x8x1xf32>
    %16 = arith.addf %12, %15 : vector<4x8x1xf32>
    %cst_6 = arith.constant 7.812500e-03 : f32
    %17 = vector.broadcast %cst_6 : f32 to vector<4x8x1xf32>
    %18 = arith.mulf %9, %17 : vector<4x8x1xf32>
    %cst_7 = arith.constant 7.812500e-03 : f32
    %19 = vector.broadcast %cst_7 : f32 to vector<4x8x1xf32>
    %20 = arith.mulf %16, %19 : vector<4x8x1xf32>
    %21 = arith.mulf %18, %18 : vector<4x8x1xf32>
    %22 = arith.subf %20, %21 : vector<4x8x1xf32>
    %cst_8 = arith.constant 0.000000e+00 : f32
    %23 = vector.broadcast %cst_8 : f32 to vector<4x8x1xf32>
    %24 = arith.maximumf %22, %23 : vector<4x8x1xf32>
    %cst_9 = arith.constant 9.99999974E-6 : f32
    %25 = vector.broadcast %cst_9 : f32 to vector<4x8x1xf32>
    %26 = arith.addf %24, %25 : vector<4x8x1xf32>
    %27 = math.rsqrt %26 : vector<4x8x1xf32>
    %28 = arith.mulf %18, %27 : vector<4x8x1xf32>
    %29 = vector.broadcast %27 : vector<4x8x1xf32> to vector<4x8x64xf32>
    %30 = arith.mulf %2, %29 : vector<4x8x64xf32>
    %31 = vector.shape_cast %30 : vector<4x8x64xf32> to vector<32x64xf32>
    %32 = arith.truncf %31 : vector<32x64xf32> to vector<32x64xbf16>
    %33 = vector.broadcast %27 : vector<4x8x1xf32> to vector<4x8x64xf32>
    %34 = arith.mulf %4, %33 : vector<4x8x64xf32>
    %35 = vector.shape_cast %34 : vector<4x8x64xf32> to vector<32x64xf32>
    %36 = arith.truncf %35 : vector<32x64xf32> to vector<32x64xbf16>
    %c0_10 = arith.constant 0 : index
    %c0_11 = arith.constant 0 : index
    %c0_12 = arith.constant 0 : index
    %37 = vector.load %arg2[%c0_10, %c0_11, %c0_12] : memref<2x64x128xbf16, #tpu.memory_space<vmem>>, vector<2x64x128xbf16>
    %38 = vector.extract_strided_slice %37 {offsets = [0, 0, 0], sizes = [1, 64, 128], strides = [1, 1, 1]} : vector<2x64x128xbf16> to vector<1x64x128xbf16>
    %39 = vector.shape_cast %38 : vector<1x64x128xbf16> to vector<64x128xbf16>
    %cst_13 = arith.constant dense<0.000000e+00> : vector<32x128xf32>
    %40 = tpu.matmul %32, %39, %cst_13 {dimension_numbers = #tpu.dot_dimension_numbers<[1], [0], [0], [1], [0, 0, 1, 1], [], []>} : vector<32x64xbf16>, vector<64x128xbf16>, vector<32x128xf32> -> vector<32x128xf32>
    %41 = vector.extract_strided_slice %37 {offsets = [1, 0, 0], sizes = [1, 64, 128], strides = [1, 1, 1]} : vector<2x64x128xbf16> to vector<1x64x128xbf16>
    %42 = vector.shape_cast %41 : vector<1x64x128xbf16> to vector<64x128xbf16>
    %cst_14 = arith.constant dense<0.000000e+00> : vector<32x128xf32>
    %43 = tpu.matmul %36, %42, %cst_14 {dimension_numbers = #tpu.dot_dimension_numbers<[1], [0], [0], [1], [0, 0, 1, 1], [], []>} : vector<32x64xbf16>, vector<64x128xbf16>, vector<32x128xf32> -> vector<32x128xf32>
    %44 = arith.addf %40, %43 : vector<32x128xf32>
    %45 = vector.shape_cast %44 : vector<32x128xf32> to vector<4x8x128xf32>
    %c0_15 = arith.constant 0 : index
    %c0_16 = arith.constant 0 : index
    %46 = vector.load %arg3[%c0_15, %c0_16] : memref<2x128xf32, #tpu.memory_space<vmem>>, vector<2x128xf32>
    %47 = vector.extract_strided_slice %46 {offsets = [0, 0], sizes = [1, 128], strides = [1, 1]} : vector<2x128xf32> to vector<1x128xf32>
    %48 = vector.shape_cast %47 : vector<1x128xf32> to vector<1x1x128xf32>
    %49 = vector.broadcast %28 : vector<4x8x1xf32> to vector<4x8x128xf32>
    %50 = vector.broadcast %48 : vector<1x1x128xf32> to vector<4x8x128xf32>
    %51 = arith.mulf %49, %50 : vector<4x8x128xf32>
    %52 = arith.subf %45, %51 : vector<4x8x128xf32>
    %53 = vector.extract_strided_slice %46 {offsets = [1, 0], sizes = [1, 128], strides = [1, 1]} : vector<2x128xf32> to vector<1x128xf32>
    %54 = vector.shape_cast %53 : vector<1x128xf32> to vector<1x1x128xf32>
    %55 = vector.broadcast %54 : vector<1x1x128xf32> to vector<4x8x128xf32>
    %56 = arith.addf %52, %55 : vector<4x8x128xf32>
    %c0_17 = arith.constant 0 : index
    %c0_18 = arith.constant 0 : index
    %c0_19 = arith.constant 0 : index
    %57 = vector.load %arg4[%c0_17, %c0_18, %c0_19] : memref<4x8x128xf32, #tpu.memory_space<vmem>>, vector<4x8x128xf32>
    tpu.vector_store %arg4[%c0_17, %c0_18, %c0_19], %56 {strides = array<i32>} : memref<4x8x128xf32, #tpu.memory_space<vmem>>, vector<4x8x128xf32>,
    return
  }
  func.func @transform_0(%arg0: i32) -> (i32, i32, i32, i32) {
    %c0_i32 = arith.constant 0 : i32
    %c0_i32_0 = arith.constant 0 : i32
    %c0_i32_1 = arith.constant 0 : i32
    %c0_i32_2 = arith.constant 0 : i32
    return %arg0, %c0_i32, %c0_i32_0, %c0_i32_1 : i32, i32, i32, i32
  }
  func.func @transform_1(%arg0: i32) -> (i32, i32, i32) {
    %c0_i32 = arith.constant 0 : i32
    %c0_i32_0 = arith.constant 0 : i32
    %c0_i32_1 = arith.constant 0 : i32
    %c0_i32_2 = arith.constant 0 : i32
    return %c0_i32, %c0_i32_0, %c0_i32_1 : i32, i32, i32
  }
  func.func @transform_2(%arg0: i32) -> (i32, i32) {
    %c0_i32 = arith.constant 0 : i32
    %c0_i32_0 = arith.constant 0 : i32
    %c0_i32_1 = arith.constant 0 : i32
    return %c0_i32, %c0_i32_0 : i32, i32
  }
  func.func @transform_3(%arg0: i32) -> (i32, i32, i32) {
    %c0_i32 = arith.constant 0 : i32
    %c0_i32_0 = arith.constant 0 : i32
    %c0_i32_1 = arith.constant 0 : i32
    return %arg0, %c0_i32, %c0_i32_0 : i32, i32, i32
  }
}

</mosaic_0001>

<bundles_post_ra>
// kernel: patch_merging.1
= control target key start
LH: loop header
LB: loop body
LE: loop exit
PB: predicated region body
PF: predicated region fallthrough
CT: control target
= control target key end

     0   :  { %8 = vsyncpa [#allocation3], 0  ;;  %s973_s0 = inlined_call_operand.vmem [shape: f32[16,2,8,64], index: 0, kind: input, shape index: {}]   ;;  %s974_s1 = inlined_call_operand.vmem [shape: bf16[2,64,128], index: 1, kind: input, shape index: {}]   ;;  %s975_s2 = inlined_call_operand.vmem [shape: f32[2,128], index: 2, kind: input, shape index: {}]   ;;  %s976_s3 = inlined_call_operand.hbm [shape: f32[16,8,128], index: 3, kind: output, shape index: {}]  }
   0x1   :  { %10 = vsyncpa [#allocation3 + $0x1], 0  ;;  %s773_s12 = smov 0   ;;  %s775_s13 = smov 0  }
   0x2   :  { %s777_s14 = smov 0   ;;  %s779_s15 = smov 0  }
   0x3 LB: > { %s794_s16 = sadd.s32 4294967295, %s748_s15   ;;  %s568_s17 = sadd.s32 4294967294, %s748_s15   ;;  %s748_s15 = sphi %s779_s15, %s982_s15   ;;  %s744_s14 = sphi %s777_s14, %s981_s14   ;;  %s740_s13 = sphi %s775_s13, %s980_s13   ;;  %s736_s12 = sphi %s773_s12, %s979_s12  }
   0x4   : > { %s798_s18 = sadd.s32 1, %s748_s15   ;;  %s91_s19 = sadd.s32 1, %s744_s14 }
   0x5   : > { %s88_s20 = ssub.s32 %s748_s15, %s798_s18  ;;  %p101_p0 = scmp.ne.s32.totalorder %s744_s14, %s740_s13 }
   0x6   : > { %p89_p1 = scmp.eq.s32.totalorder %s88_s20, 0  ;;  %p102_p2 = scmp.eq.s32.totalorder %s794_s16, 3 }
   0x7   : > { %p107_p3 = scmp.ne.s32.totalorder %s740_s13, %s736_s12  ;;  %p108_p4 = scmp.eq.s32.totalorder %s568_s17, 3 }
   0x8   : > { %s809_s21 = scalar_select %p89_p1, %s744_s14, %s91_s19  }
   0x9   : > { %p811_p5 = por %p102_p2, %p101_p0  ;;  %p815_p6 = por %p108_p4, %p107_p3 }
   0xa   : > { %p571_p7 = scmp.ge.s32.totalorder %s748_s15, 1  ;;  %p142_p8 = scmp.lt.s32.totalorder %s748_s15, 5 }
   0xc   : > { %p143_p9 = pnand %p571_p7, %p142_p8 }
   0xd   : > { %s573_s24 = sshll.u32 (!%p143_p9), %s794_s16, 2  ;;  %s164_s29 = sand.u32 (!%p143_p9), 1, %s740_s13  }
   0xe   : > { %146 = sbr.rel (%p143_p9) target bundleno = 438 (0x1b6), region = 32  ;;  %p168_p10 = scmp.lt.s32.totalorder (!%p143_p9), %s573_s24, 15 }
   0xf   : > { %s572_s30 = sshll.u32 (!%p143_p9), %s164_s29, 5  ;;  %s594_s6 = sshll.u32 (!%p143_p9), %s794_s16, 9 }
  0x10   : > { %s166_s4 = scalar_lea.vmem (!%p143_p9), [#allocation2], %s572_s30  ;;  %s929_s9 = scalar_lea.hbm (!%p143_p9), %s976_s3, %s594_s6 }
  0x11   : > { %s506_s5 = sshll.u32 (!%p143_p9), %s166_s4, 4  ;;  %s933_s10 = scalar_lea.sflag (!%p143_p9), [#allocation3], %s164_s29  ;;  %s924_s5 = int_to_ptr.vmem [resolvable:$true] %s506_s5 }
  0x12   : > { %s688_s16 = scalar_lea.vmem (!%p143_p9), %s924_s5, 512  ;;  %s750_s11 = smov (!%p143_p9), [#allocation2]  }
  0x13   : > { %s984_s24 = smov (!%p168_p10, %s573_s24), 15  ;;  %vm184_vm0 = vcmask 523264   ;;  %v672_v32 = vld [vmem:[%s974_s1 + $0x38] sm:$0xff]   ;;  %v674_v34 = vld [vmem:[%s974_s1 + $0x30] sm:$0xff]   ;;  %v676_v36 = vld [vmem:[%s974_s1 + $0x28] sm:$0xff]   ;;  %p689_p11 = scmp.ne.s32.totalorder %s924_s5, %s688_s16 }
  0x14   : > { %s593_s25 = sshll.u32 %s984_s24, 4  ;;  %v673_v33 = vld [vmem:[%s974_s1 + $0x18] sm:$0xff]   ;;  %v675_v35 = vld [vmem:[%s974_s1 + $0x10] sm:$0xff]   ;;  %607 = vmatprep.subr.bf16.mxu0 %v672_v32  ;;  %v677_v37 = vld [vmem:[%s974_s1 + $0x8] sm:$0xff]   ;;  %s692_s17 = sshll.u32 %s750_s11, 4  ;;  %s693_s17 = int_to_ptr.vmem [resolvable:$false] %s692_s17 }
  0x15   : > { %s172_s28 = scalar_lea.vmem %s973_s0, %s593_s25  ;;  %619 = vmatprep.subr.bf16.mxu1 %v673_v33  ;;  %608 = vmatpush3.bf16.msra.mxu0 %v672_v32  ;;  %v678_v38 = vld [vmem:[%s974_s1 + $0x20] sm:$0xff]   ;;  %p690_p12 = pnand %p689_p11, %p811_p5 }
  0x16   : > { %v825_v0 = vld [vmem:[%s172_s28 + $0x8] sm:$0xff]  ;;  %v827_v1 = vld [vmem:[%s172_s28] sm:$0xff]  ;;  %v829_v2 = vld [vmem:[%s172_s28 + $0x18] sm:$0xff]  ;;  %620 = vmatpush3.bf16.msra.mxu1 %v673_v33  ;;  %609 = vmatprep.subr.bf16.mxu0 %v674_v34  ;;  %s694_s19 = scalar_lea.vmem %s693_s17, 1024  ;;  %p695_p0 = scmp.lt.s32.totalorder %s924_s5, %s693_s17 }
  0x17   : > { %v197_v3 = vsel %vm184_vm0, %v825_v0, 0.0  ;;  %v185_v4 = vsel %vm184_vm0, %v827_v1, 0.0  ;;  %v835_v5 = vld [vmem:[%s172_s28 + $0x10] sm:$0xff]  ;;  %v200_v6 = vsel %vm184_vm0, %v829_v2, 0.0  ;;  %v843_v9 = vld [vmem:[%s172_s28 + $0x20] sm:$0xff]  ;;  %v849_v12 = vld [vmem:[%s172_s28 + $0x38] sm:$0xff]  ;;  %v213_v17 = vmul.f32 %v827_v1, %v827_v1  ;;  %621 = vmatprep.subr.bf16.mxu1 %v675_v35  ;;  %p691_p13 = pneg %p690_p12  ;;  %p696_p1 = scmp.lt.s32.totalorder %s694_s19, %s688_s16 }
  0x18   : > { %198 = vadd.xlane.f32.xlu1 %v197_v3  ;;  %186 = vadd.xlane.f32.xlu0 %v185_v4  ;;  %v188_v7 = vsel %vm184_vm0, %v835_v5, 0.0  ;;  %v841_v8 = vld [vmem:[%s172_s28 + $0x30] sm:$0xff]  ;;  %v191_v11 = vsel %vm184_vm0, %v843_v9, 0.0  ;;  %v851_v13 = vld [vmem:[%s172_s28 + $0x28] sm:$0xff]  ;;  %v206_v14 = vsel %vm184_vm0, %v849_v12, 0.0  ;;  %v214_v16 = vmul.f32 %v835_v5, %v835_v5  ;;  %v679_v39 = vld [vmem:[%s974_s1] sm:$0xff]  }
  0x19   : > { %v194_v10 = vsel %vm184_vm0, %v841_v8, 0.0  ;;  %v203_v15 = vsel %vm184_vm0, %v851_v13, 0.0  ;;  %v217_v19 = vsel %vm184_vm0, %v213_v17, 0.0  ;;  %v230_v20 = vmul.f32 %v829_v2, %v829_v2  ;;  %610 = vmatpush3.bf16.msra.mxu0 %v674_v34  ;;  %p697_p2 = por %p696_p1, %p695_p0 }
  0x1a   : > { %v220_v18 = vsel %vm184_vm0, %v214_v16, 0.0  ;;  %v229_v21 = vmul.f32 %v825_v0, %v825_v0  ;;  %v216_v24 = vmul.f32 %v841_v8, %v841_v8  ;;  %v215_v25 = vmul.f32 %v843_v9, %v843_v9  ;;  %622 = vmatpush3.bf16.msra.mxu1 %v675_v35  ;;  %611 = vmatprep.subr.bf16.mxu0 %v676_v36 }
  0x1b   : > { %v236_v22 = vsel %vm184_vm0, %v230_v20, 0.0  ;;  %v232_v28 = vmul.f32 %v849_v12, %v849_v12  ;;  %v231_v29 = vmul.f32 %v851_v13, %v851_v13  ;;  %623 = vmatprep.subr.bf16.mxu1 %v677_v37  ;;  %p698_p3 = pnand %p697_p2, %p691_p13 }
  0x1c   : > { %201 = vadd.xlane.f32.xlu1 %v200_v6  ;;  %189 = vadd.xlane.f32.xlu0 %v188_v7  ;;  %v233_v23 = vsel %vm184_vm0, %v229_v21, 0.0  ;;  %v226_v26 = vsel %vm184_vm0, %v216_v24, 0.0  ;;  %v223_v27 = vsel %vm184_vm0, %v215_v25, 0.0 }
  0x1d   : > { %v242_v30 = vsel %vm184_vm0, %v232_v28, 0.0  ;;  %v239_v31 = vsel %vm184_vm0, %v231_v29, 0.0  ;;  %612 = vmatpush3.bf16.msra.mxu0 %v676_v36 }
  0x1e   : > { %624 = vmatpush3.bf16.msra.mxu1 %v677_v37  ;;  %613 = vmatprep.subr.bf16.mxu0 %v678_v38 }
  0x1f   : > { %625 = vmatprep.subr.bf16.mxu1 %v679_v39 }
  0x20   : > { %195 = vadd.xlane.f32.xlu1 %v194_v10  ;;  %192 = vadd.xlane.f32.xlu0 %v191_v11 }
  0x21   : > { %614 = vmatpush3.bf16.msra.mxu0 %v678_v38 }
  0x22   : > { %626 = vmatpush3.bf16.msra.mxu1 %v679_v39 }
  0x24   : > { %207 = vadd.xlane.f32.xlu1 %v206_v14  ;;  %204 = vadd.xlane.f32.xlu0 %v203_v15 }
  0x28   : > { %221 = vadd.xlane.f32.xlu1 %v220_v18  ;;  %218 = vadd.xlane.f32.xlu0 %v217_v19 }
  0x2c   : > { %237 = vadd.xlane.f32.xlu1 %v236_v22  ;;  %234 = vadd.xlane.f32.xlu0 %v233_v23 }
  0x30   : > { %227 = vadd.xlane.f32.xlu1 %v226_v26  ;;  %224 = vadd.xlane.f32.xlu0 %v223_v27 }
  0x34   : > { %243 = vadd.xlane.f32.xlu1 %v242_v30  ;;  %240 = vadd.xlane.f32.xlu0 %v239_v31 }
  0xa1   : > { %v199_v40 = vpop.xlane.xlu1 %198  ;;  %v187_v41 = vpop.xlane.xlu0 %186 }
  0xa2   : > { %v209_v48 = vadd.f32 %v199_v40, %v187_v41 }
  0xa4   : > { %v249_v52 = vmul.f32 0.0078125, %v209_v48  ;;  %v468_v48 = vlaneseq }
  0xa5   : > { %v202_v42 = vpop.xlane.xlu1 %201  ;;  %v190_v43 = vpop.xlane.xlu0 %189 }
  0xa6   : > { %v210_v49 = vadd.f32 %v202_v42, %v190_v43  ;;  %v257_v58 = vmul.f32 %v249_v52, %v249_v52 }
  0xa8   : > { %v250_v53 = vmul.f32 0.0078125, %v210_v49  ;;  %v469_v49 = vshrl.u32 %v468_v48, 7 }
  0xa9   : > { %v196_v44 = vpop.xlane.xlu1 %195  ;;  %v193_v45 = vpop.xlane.xlu0 %192 }
  0xaa   : > { %v258_v60 = vmul.f32 %v250_v53, %v250_v53 }
  0xad   : > { %v208_v46 = vpop.xlane.xlu1 %207  ;;  %v205_v47 = vpop.xlane.xlu0 %204 }
  0xae   : > { %v212_v59 = vadd.f32 %v208_v46, %v196_v44  ;;  %v211_v61 = vadd.f32 %v205_v47, %v193_v45 }
  0xb0   : > { %v252_v10 = vmul.f32 0.0078125, %v212_v59  ;;  %v251_v11 = vmul.f32 0.0078125, %v211_v61 }
  0xb1   : > { %v222_v50 = vpop.xlane.xlu1 %221  ;;  %v219_v51 = vpop.xlane.xlu0 %218 }
  0xb2   : > { %v260_v22 = vmul.f32 %v252_v10, %v252_v10  ;;  %v259_v23 = vmul.f32 %v251_v11, %v251_v11 }
  0xb5   : > { %v238_v54 = vpop.xlane.xlu1 %237  ;;  %v235_v55 = vpop.xlane.xlu0 %234 }
  0xb6   : > { %v246_v56 = vadd.f32 %v238_v54, %v222_v50  ;;  %v245_v57 = vadd.f32 %v235_v55, %v219_v51  ;;  %v470_v50 = vsub.s32 0, %v469_v49 }
  0xb8   : > { %v254_v62 = vmul.f32 0.0078125, %v246_v56  ;;  %v253_v63 = vmul.f32 0.0078125, %v245_v57 }
  0xb9   : > { %v228_v3 = vpop.xlane.xlu1 %227  ;;  %v225_v4 = vpop.xlane.xlu0 %224 }
  0xba   : > { %v262_v6 = vsub.f32 %v254_v62, %v258_v60  ;;  %v261_v7 = vsub.f32 %v253_v63, %v257_v58 }
  0xbc   : > { %v266_v14 = vmax.f32 %v262_v6, 0.0  ;;  %v265_v15 = vmax.f32 %v261_v7, 0.0 }
  0xbd   : > { %v244_v16 = vpop.xlane.xlu1 %243  ;;  %v241_v17 = vpop.xlane.xlu0 %240 }
  0xbe   : > { %v270_v18 = vadd.f32 1e-05, %v266_v14  ;;  %v269_v19 = vadd.f32 1e-05, %v265_v15  ;;  %v248_v20 = vadd.f32 %v244_v16, %v228_v3  ;;  %v247_v21 = vadd.f32 %v241_v17, %v225_v4 }
  0xc0   : > { %680 = vrsqrt.f32 %v270_v18  ;;  %v256_v24 = vmul.f32 0.0078125, %v248_v20  ;;  %v255_v25 = vmul.f32 0.0078125, %v247_v21 }
  0xc1   : > { %682 = vrsqrt.f32 %v269_v19 }
  0xc2   : > { %v264_v26 = vsub.f32 %v256_v24, %v260_v22  ;;  %v263_v27 = vsub.f32 %v255_v25, %v259_v23 }
  0xc4   : > { %v268_v28 = vmax.f32 %v264_v26, 0.0  ;;  %v267_v29 = vmax.f32 %v263_v27, 0.0 }
  0xc6   : > { %v272_v30 = vadd.f32 1e-05, %v268_v28  ;;  %v271_v31 = vadd.f32 1e-05, %v267_v29 }
  0xc8   : > { %684 = vrsqrt.f32 %v272_v30 }
  0xc9   : > { %686 = vrsqrt.f32 %v271_v31 }
  0xcd   : > { %v681_v32 = vpop.eup %680 }
  0xce   : > { %v683_v33 = vpop.eup %682  ;;  %v288_v34 = vmul.f32 %v681_v32, %v829_v2  ;;  %v282_v35 = vmul.f32 %v681_v32, %v835_v5  ;;  %v278_v36 = vmul.f32 %v681_v32, %v250_v53 }
  0xcf   : > { %v287_v37 = vmul.f32 %v683_v33, %v825_v0  ;;  %v281_v38 = vmul.f32 %v683_v33, %v827_v1  ;;  %v277_v39 = vmul.f32 %v683_v33, %v249_v52 }
  0xd1   : > { %v291_v40 = vpack.c.bf16 %v288_v34, %v287_v37  ;;  %v285_v41 = vpack.c.bf16 %v282_v35, %v281_v38 }
  0xd3   : > { %615 = vmatprep.mubr.msk.bf16.mxu0 %vm184_vm0, %v291_v40  ;;  %627 = vmatprep.mubr.msk.bf16.mxu1 %vm184_vm0, %v285_v41 }
  0xd5   : > { %v685_v42 = vpop.eup %684 }
  0xd6   : > { %v687_v43 = vpop.eup %686  ;;  %v290_v44 = vmul.f32 %v685_v42, %v849_v12  ;;  %v284_v2 = vmul.f32 %v685_v42, %v841_v8  ;;  %v280_v5 = vmul.f32 %v685_v42, %v252_v10  ;;  %v467_v8 = vld [vmem:[%s975_s2] sm:$0x3]  ;;  %v482_v12 = vsub.s32 1, %v469_v49 }
  0xd7   : > { %v289_v45 = vmul.f32 %v687_v43, %v851_v13  ;;  %v283_v0 = vmul.f32 %v687_v43, %v843_v9  ;;  %v279_v1 = vmul.f32 %v687_v43, %v251_v11  ;;  %v471_v13 = vrot.slane %v467_v8, %v470_v50 }
  0xd8   : > { %v483_v54 = vrot.slane %v467_v8, %v482_v12 }
  0xd9   : > { %v292_v46 = vpack.c.bf16 %v290_v44, %v289_v45  ;;  %v286_v47 = vpack.c.bf16 %v284_v2, %v283_v0  ;;  %v474_v53 = vmul.f32 %v471_v13, %v279_v1  ;;  %v472_v59 = vmul.f32 %v471_v13, %v277_v39 }
  0xda   : > { %v475_v4 = vmul.f32 %v471_v13, %v280_v5  ;;  %v473_v15 = vmul.f32 %v471_v13, %v278_v36 }
  0xdb   : > { %616 = vmatmul.mubr.msk.bf16.vlgmr.msra.gmra.mxu0 %vm184_vm0, %v292_v46  ;;  %628 = vmatmul.mubr.msk.bf16.vlgmr.msra.gmra.mxu1 %vm184_vm0, %v286_v47 }
 0x19b   : > { %v617_v51 = vpop.f32.mrf.mxu0  ;;  %v629_v52 = vpop.f32.mrf.mxu1 }
 0x19c   : > { %v461_v9 = vadd.f32 %v629_v52, %v617_v51 }
 0x19d   : > { %v373_v55 = vpop.f32.mrf.mxu0  ;;  %v452_v56 = vpop.f32.mrf.mxu1 }
 0x19e   : > { %v478_v57 = vsub.f32 %v461_v9, %v474_v53  ;;  %v453_v58 = vadd.f32 %v452_v56, %v373_v55 }
 0x19f   : > { %v618_v60 = vpop.f32.mrf.mxu0  ;;  %v630_v61 = vpop.f32.mrf.mxu1 }
 0x1a0   : > { %v486_v62 = vadd.f32 %v483_v54, %v478_v57  ;;  %v476_v63 = vsub.f32 %v453_v58, %v472_v59  ;;  %v464_v3 = vadd.f32 %v630_v61, %v618_v60 }
 0x1a1   : > { %v376_v6 = vpop.f32.mrf.mxu0  ;;  %v455_v7 = vpop.f32.mrf.mxu1 }
 0x1a2   : > { %490 = vst [vmem:[%s166_s4 + $0x10] sm:$0xff] %v486_v62  ;;  %v484_v10 = vadd.f32 %v483_v54, %v476_v63  ;;  %v479_v11 = vsub.f32 %v464_v3, %v475_v4  ;;  %v456_v14 = vadd.f32 %v455_v7, %v376_v6 }
 0x1a4   : > { %488 = vst [vmem:[%s166_s4] sm:$0xff] %v484_v10  ;;  %v487_v16 = vadd.f32 %v483_v54, %v479_v11  ;;  %v477_v17 = vsub.f32 %v456_v14, %v473_v15 }
 0x1a6   : > { %491 = vst [vmem:[%s166_s4 + $0x18] sm:$0xff] %v487_v16  ;;  %v485_v18 = vadd.f32 %v483_v54, %v477_v17 }
 0x1a8   : > { %489 = vst [vmem:[%s166_s4 + $0x8] sm:$0xff] %v485_v18 }
 0x1a9   : > { %701 = shalt.err (!%p698_p3)
}
 0x1aa   : > { %s702_s20 = scalar_lea.hbm %s929_s9, 512  ;;  %s706_s26 = scalar_lea.hbm %s976_s3, 2048 }
 0x1ab   : > { %p703_p4 = scmp.ne.s32.totalorder %s929_s9, %s702_s20  ;;  %p707_p9 = scmp.lt.s32.totalorder %s929_s9, %s976_s3 }
 0x1ac   : > { %p708_p10 = scmp.lt.s32.totalorder %s706_s26, %s702_s20 }
 0x1ad   : > { %p704_p7 = pnand %p703_p4, %p811_p5 }
 0x1ae   : > { %p709_p11 = por %p708_p10, %p707_p9 }
 0x1af   : > { %p705_p8 = pneg %p704_p7 }
 0x1b1   : > { %p710_p12 = pnand %p709_p11, %p705_p8 }
 0x1b3   : > { %713 = shalt.err (!%p710_p12)
}
 0x1b4   : > { %s751_s29 = smov 128   ;;  %s752_s30 = smov 8  }
 0x1b5   : > { %631 = dma.vmem_to_hbm [thread:$0]  (%p811_p5), %s924_s5, 512, %s929_s9, %s933_s10, %s751_s29, %s751_s29, %s752_s30  }
 0x1b6 PF: > { %p637_p13 = scmp.ge.s32.totalorder %s748_s15, 2  ;;  %s521_s4 = sand.u32 1, %s736_s12  }
 0x1b7   : > { %s522_s6 = scalar_lea.sflag [#allocation3], %s521_s4 }
 0x1b8   : > { %p634_p0 = pnand %p637_p13, %p815_p6 }
 0x1ba   : > { %p635_p1 = pneg %p634_p0 }
 0x1bc   : > { %731 = dma.done.wait (%p635_p1), %s522_s6, 512  }
 0x1bd   : > { %733 = vsyncadd (%p635_p1), %s522_s6, 4294966784  ;;  %p13_p2 = scmp.ge.s32.totalorder %s798_s18, 6   ;;  %s979_s12 = smov %s740_s13 }
 0x1be   : > { %s980_s13 = smov %s744_s14  ;;  %s981_s14 = smov %s809_s21 }
 0x1bf   : > { %s982_s15 = smov %s798_s18  ;;  %15 = sbr.rel (!%p13_p2) target bundleno = 3 (0x3), region = 67 }
 0x1c4   :  { %527 = vsyncpa [#allocation3], 1 }
 0x1c5   :  { %529 = vsyncpa [#allocation3 + $0x1], 1 }

</bundles_post_ra>
